<compile_context>
chip_gen: v6e
topology: v6e:2x2x1
jax: 0.10.0
libtpu: 0.0.40
codegen_flags: <defaults>
</compile_context>

<pallas_src>
import functools
import math

import jax
import jax.numpy as jnp
from jax.experimental import pallas as pl
from jax.experimental.pallas import tpu as pltpu


def _round_up(x, m):
    return ((x + m - 1) // m) * m


def _pos_encoder_kernel(p_ref, w12_ref, b12_ref, o_ref, *, alpha, add_bias):
    # (tm, pos_dim) block of positions, scaled by alpha (single VPU mul).
    p = alpha * p_ref[...].astype(jnp.float32)

    # One fused MXU matmul: (tm, pos_dim) @ (pos_dim, 2E) -> (tm, 2E) = [p1 | p2].
    z = jnp.dot(p, w12_ref[...], preferred_element_type=jnp.float32)

    if add_bias:  # static Python bool -> two compiled kernel variants
        z = z + b12_ref[...]          # (1, 2E) broadcast over sublanes

    # Single lane-dense (tm, 4E) output slab: [cos(p1) | cos(p2) | sin(p1) | sin(p2)].
    out = jnp.concatenate([jnp.cos(z), jnp.sin(z)], axis=-1)
    o_ref[...] = out.astype(o_ref.dtype)


def position_encoder_forward(p, w1, b1, w2, b2, alpha, add_bias, *, tm=1024):
    """JAX wrapper. p: (..., pos_dim). Returns [cos(p1), sin(p1), cos(p2), sin(p2)],
    each of shape p.shape[:-1] + (embed_dim,)."""
    pos_dim = p.shape[-1]
    embed_dim = w1.shape[0]
    lead_shape = p.shape[:-1]
    n = math.prod(lead_shape) if lead_shape else 1

    out_dtype = p.dtype  # keep module semantics; bf16 here would halve HBM writeback
    out_itemsize = jnp.dtype(out_dtype).itemsize

    # Pack weights/biases once at trace time: pre-transposed, f32, fused.
    w12 = jnp.concatenate([w1.T, w2.T], axis=1).astype(jnp.float32)          # (pos_dim, 2E)
    b12 = jnp.concatenate([b1, b2]).reshape(1, 2 * embed_dim).astype(jnp.float32)

    p2d = p.reshape(n, pos_dim)

    # ---- Row-tile selection (memory-bound: as big as the VMEM budget allows).
    # Double-buffered per-step VMEM: 2 * tm * (4E*out_itemsize + pos_dim*4) bytes.
    vmem_budget = 12 * 1024 * 1024            # conservative across v5e/v6e/v7x
    row_bytes = 4 * embed_dim * out_itemsize + pos_dim * 4
    tm_cap = max(8, (vmem_budget // (2 * row_bytes)) // 8 * 8)
    tm_cap = min(tm_cap, max(8, tm), 2048)

    rows8 = _round_up(n, 8)
    if rows8 <= tm_cap:
        # Keep >= 2 grid steps when there is enough work (v7x has 2 TCs/chip).
        tm_eff = _round_up((rows8 + 1) // 2, 8) if rows8 >= 16 else rows8
    else:
        tm_eff = tm_cap

    n_pad = _round_up(n, tm_eff)
    if n_pad != n:
        p2d = jnp.pad(p2d, ((0, n_pad - n), (0, 0)))

    grid = (n_pad // tm_eff,)
    kernel = functools.partial(_pos_encoder_kernel,
                               alpha=float(alpha), add_bias=bool(add_bias))

    out = pl.pallas_call(
        kernel,
        out_shape=jax.ShapeDtypeStruct((n_pad, 4 * embed_dim), out_dtype),
        grid_spec=pltpu.PrefetchScalarGridSpec(
            num_scalar_prefetch=0,
            grid=grid,
            in_specs=[
                pl.BlockSpec((tm_eff, pos_dim), lambda i: (i, 0)),            # positions
                pl.BlockSpec((pos_dim, 2 * embed_dim), lambda i: (0, 0)),     # fused W
                pl.BlockSpec((1, 2 * embed_dim), lambda i: (0, 0)),           # fused b
            ],
            out_specs=pl.BlockSpec((tm_eff, 4 * embed_dim), lambda i: (i, 0)),
        ),
        compiler_params=pltpu.CompilerParams(
            dimension_semantics=("parallel",),
            vmem_limit_bytes=32 * 1024 * 1024,
        ),
    )(p2d, w12, b12)

    out = out[:n]
    e = embed_dim
    out_shape = lead_shape + (embed_dim,)
    cos1 = out[:, 0 * e:1 * e].reshape(out_shape)
    cos2 = out[:, 1 * e:2 * e].reshape(out_shape)
    sin1 = out[:, 2 * e:3 * e].reshape(out_shape)
    sin2 = out[:, 3 * e:4 * e].reshape(out_shape)
    return [cos1, sin1, cos2, sin2]


def init_position_encoder_params(key, pos_dim, embed_dim, dtype=jnp.float32):
    """Deterministic init matching reset_parameters():
       weights ~ U(-1/pos_dim, 1/pos_dim), biases ~ U(0, pi)."""
    k1, k2, k3, k4 = jax.random.split(key, 4)
    lim = 1.0 / pos_dim
    w1 = jax.random.uniform(k1, (embed_dim, pos_dim), dtype, -lim, lim)
    w2 = jax.random.uniform(k2, (embed_dim, pos_dim), dtype, -lim, lim)
    b1 = jax.random.uniform(k3, (embed_dim,), dtype, 0.0, math.pi)
    b2 = jax.random.uniform(k4, (embed_dim,), dtype, 0.0, math.pi)
    return w1, b1, w2, b2


if __name__ == "__main__":
    key = jax.random.PRNGKey(0)
    kp, kparam = jax.random.split(key)

    # Small shapes: batch=2, seq=8, pos_dim=4, embed_dim=32, alpha=100.0
    batch, seq, pos_dim, embed_dim = 2, 8, 4, 32
    alpha = 100.0

    p = jax.random.normal(kp, (batch, seq, pos_dim), jnp.float32)
    w1, b1, w2, b2 = init_position_encoder_params(kparam, pos_dim, embed_dim)

    # Run with add_bias=True (common path) and add_bias=False.
    p_code = position_encoder_forward(p, w1, b1, w2, b2, alpha, add_bias=True)
    p_code_nb = position_encoder_forward(p, w1, b1, w2, b2, alpha, add_bias=False)
    jax.block_until_ready(p_code)
    jax.block_until_ready(p_code_nb)

    # Pure-JAX reference check.
    ps = alpha * p
    p1 = ps @ w1.T + b1
    p2 = ps @ w2.T + b2
    ref = [jnp.cos(p1), jnp.sin(p1), jnp.cos(p2), jnp.sin(p2)]
    p1n = ps @ w1.T
    p2n = ps @ w2.T
    ref_nb = [jnp.cos(p1n), jnp.sin(p1n), jnp.cos(p2n), jnp.sin(p2n)]

    for got, want in zip(p_code, ref):
        assert got.shape == (batch, seq, embed_dim)
        assert jnp.allclose(got, want, atol=1e-5, rtol=1e-5)
    for got, want in zip(p_code_nb, ref_nb):
        assert jnp.allclose(got, want, atol=1e-5, rtol=1e-5)

    print("KERNEL_OK")
</pallas_src>

<mosaic_0001>
module attributes {stable_mosaic.version = 11 : i64} {
  func.func @_pos_encoder_kernel(%arg0: i32, %arg1: memref<8x4xf32, #tpu.memory_space<vmem>>, %arg2: memref<4x64xf32, #tpu.memory_space<vmem>>, %arg3: memref<1x64xf32, #tpu.memory_space<vmem>>, %arg4: memref<8x128xf32, #tpu.memory_space<vmem>>) attributes {dimension_semantics = [#tpu.dimension_semantics<parallel>], iteration_bounds = array<i64: 2>, scalar_prefetch = 0 : i64, scratch_operands = 0 : i64, tpu.core_type = #tpu.core_type<tc>, window_params = [{transform_indices = @transform_0, window_bounds = array<i64: 8, 4>}, {pipeline_mode = #tpu.pipeline_mode<synchronous>, transform_indices = @transform_1, window_bounds = array<i64: 4, 64>}, {pipeline_mode = #tpu.pipeline_mode<synchronous>, transform_indices = @transform_2, window_bounds = array<i64: 1, 64>}, {transform_indices = @transform_3, window_bounds = array<i64: 8, 128>}]} {
    %c0 = arith.constant 0 : index
    %c0_0 = arith.constant 0 : index
    %0 = vector.load %arg1[%c0, %c0_0] : memref<8x4xf32, #tpu.memory_space<vmem>>, vector<8x4xf32>
    %cst = arith.constant 1.000000e+02 : f32
    %1 = vector.broadcast %cst : f32 to vector<8x4xf32>
    %2 = arith.mulf %1, %0 : vector<8x4xf32>
    %c0_1 = arith.constant 0 : index
    %c0_2 = arith.constant 0 : index
    %3 = vector.load %arg2[%c0_1, %c0_2] : memref<4x64xf32, #tpu.memory_space<vmem>>, vector<4x64xf32>
    %cst_3 = arith.constant dense<0.000000e+00> : vector<8x64xf32>
    %4 = tpu.matmul %2, %3, %cst_3 {dimension_numbers = #tpu.dot_dimension_numbers<[1], [0], [0], [1], [0, 0, 1, 1], [], []>} : vector<8x4xf32>, vector<4x64xf32>, vector<8x64xf32> -> vector<8x64xf32>
    %c0_4 = arith.constant 0 : index
    %c0_5 = arith.constant 0 : index
    %5 = vector.load %arg3[%c0_4, %c0_5] : memref<1x64xf32, #tpu.memory_space<vmem>>, vector<1x64xf32>
    %6 = vector.broadcast %5 : vector<1x64xf32> to vector<8x64xf32>
    %7 = arith.addf %4, %6 : vector<8x64xf32>
    %8 = math.cos %7 : vector<8x64xf32>
    %9 = math.sin %7 : vector<8x64xf32>
    %10 = tpu.concatenate %8, %9 in 1 : vector<8x64xf32>, vector<8x64xf32> -> vector<8x128xf32>
    %c0_6 = arith.constant 0 : index
    %c0_7 = arith.constant 0 : index
    %11 = vector.load %arg4[%c0_6, %c0_7] : memref<8x128xf32, #tpu.memory_space<vmem>>, vector<8x128xf32>
    tpu.vector_store %arg4[%c0_6, %c0_7], %10 {strides = array<i32>} : memref<8x128xf32, #tpu.memory_space<vmem>>, vector<8x128xf32>,
    return
  }
  func.func @transform_0(%arg0: i32) -> (i32, i32) {
    %c0_i32 = arith.constant 0 : i32
    %c0_i32_0 = arith.constant 0 : i32
    return %arg0, %c0_i32 : i32, i32
  }
  func.func @transform_1(%arg0: i32) -> (i32, i32) {
    %c0_i32 = arith.constant 0 : i32
    %c0_i32_0 = arith.constant 0 : i32
    %c0_i32_1 = arith.constant 0 : i32
    return %c0_i32, %c0_i32_0 : i32, i32
  }
  func.func @transform_2(%arg0: i32) -> (i32, i32) {
    %c0_i32 = arith.constant 0 : i32
    %c0_i32_0 = arith.constant 0 : i32
    %c0_i32_1 = arith.constant 0 : i32
    return %c0_i32, %c0_i32_0 : i32, i32
  }
  func.func @transform_3(%arg0: i32) -> (i32, i32) {
    %c0_i32 = arith.constant 0 : i32
    %c0_i32_0 = arith.constant 0 : i32
    return %arg0, %c0_i32 : i32, i32
  }
}

</mosaic_0001>

<bundles_post_ra>
// kernel: tpu_custom_call.1
= control target key start
LH: loop header
LB: loop body
LE: loop exit
PB: predicated region body
PF: predicated region fallthrough
CT: control target
= control target key end

     0   :  { %8 = vsyncpa [#allocation3], 0  ;;  %s837_s0 = inlined_call_operand.vmem [shape: f32[16,4], index: 0, kind: input, shape index: {}]   ;;  %s838_s1 = inlined_call_operand.vmem [shape: f32[4,64], index: 1, kind: input, shape index: {}]   ;;  %s839_s2 = inlined_call_operand.vmem [shape: f32[1,64], index: 2, kind: input, shape index: {}]   ;;  %s840_s3 = inlined_call_operand.hbm [shape: f32[16,128], index: 3, kind: output, shape index: {}]  }
   0x1   :  { %10 = vsyncpa [#allocation3 + $0x1], 0  ;;  %s717_s12 = smov 0   ;;  %s719_s13 = smov 0  }
   0x2   :  { %s721_s14 = smov 0   ;;  %s723_s15 = smov 0  }
   0x3 LB: > { %s738_s16 = sadd.s32 4294967295, %s685_s15   ;;  %s541_s17 = sadd.s32 4294967294, %s685_s15   ;;  %s685_s15 = sphi %s723_s15, %s846_s15   ;;  %s681_s14 = sphi %s721_s14, %s845_s14   ;;  %s677_s13 = sphi %s719_s13, %s844_s13   ;;  %s673_s12 = sphi %s717_s12, %s843_s12  }
   0x4   : > { %s742_s18 = sadd.s32 1, %s685_s15   ;;  %s91_s19 = sadd.s32 1, %s681_s14 }
   0x5   : > { %s88_s20 = ssub.s32 %s685_s15, %s742_s18  ;;  %p101_p0 = scmp.ne.s32.totalorder %s681_s14, %s677_s13 }
   0x6   : > { %p89_p1 = scmp.eq.s32.totalorder %s88_s20, 0  ;;  %p102_p2 = scmp.eq.s32.totalorder %s738_s16, 1 }
   0x7   : > { %p107_p3 = scmp.ne.s32.totalorder %s677_s13, %s673_s12  ;;  %p108_p4 = scmp.eq.s32.totalorder %s541_s17, 1 }
   0x8   : > { %s753_s21 = scalar_select %p89_p1, %s681_s14, %s91_s19  }
   0x9   : > { %p755_p5 = por %p102_p2, %p101_p0  ;;  %p759_p6 = por %p108_p4, %p107_p3 }
   0xa   : > { %p544_p7 = scmp.ge.s32.totalorder %s685_s15, 1  ;;  %p139_p8 = scmp.lt.s32.totalorder %s685_s15, 3 }
   0xc   : > { %p140_p9 = pnand %p544_p7, %p139_p8 }
   0xd   : > { %p162_p10 = scmp.lt.s32.totalorder (!%p140_p9), %s738_s16, 1  ;;  %s695_s6 = smov (!%p140_p9), 64  }
   0xe   : > { %143 = sbr.rel (%p140_p9) target bundleno = 432 (0x1b0), region = 32  ;;  %s159_s7 = sand.u32 (!%p140_p9), 1, %s677_s13  }
   0xf   : > { %s545_s8 = sshll.u32 (!%p140_p9), %s159_s7, 3  ;;  %s559_s9 = sshll.u32 (!%p140_p9), %s738_s16, 7 }
  0x10   : > { %s161_s10 = scalar_lea.vmem (!%p140_p9), [#allocation2], %s545_s8  ;;  %s802_s20 = scalar_lea.hbm (!%p140_p9), %s840_s3, %s559_s9 }
  0x11   : > { %s482_s11 = sshll.u32 (!%p140_p9), %s161_s10, 4  ;;  %s469_s24 = scalar_lea.sflag (!%p140_p9), [#allocation3], %s159_s7  ;;  %s483_s11 = int_to_ptr.vmem [resolvable:$true] %s482_s11 }
  0x12   : > { %s625_s25 = scalar_lea.vmem (!%p140_p9), %s483_s11, 128 }
  0x13   : > { %v168_v0 = vld [vmem:[%s838_s1] sm:$0xf]  ;;  %vm180_vm0 = vcmask 1043456   ;;  %v687_v1 = vmov 0.0   ;;  %vm688_vm1 = vmmov 0   ;;  %s163_s26 = scalar_select %p162_p10, %s738_s16, 1 }
  0x14   : > { %564 = vmatprep.subr.mxu0 %v687_v1  ;;  %566 = vmatprep.mubr.msk.f32.mxu0 %vm688_vm1, %v687_v1  ;;  %vm176_vm2 = vcmask 31744   ;;  %v547_v4 = vld [vmem:[%s839_s2] ss:$0 sm:$0xff]  ;;  %v689_v19 = vmov 2102212464   ;;  %p626_p11 = scmp.ne.s32.totalorder %s483_s11, %s625_s25 }
  0x15   : > { %565 = vmatpush3.msk.msra.mxu0 %vm180_vm0, %v168_v0  ;;  %s546_s27 = sshll.u32 %s163_s26, 3  ;;  %v690_v21 = vmov 920167782   ;;  %v691_v25 = vmov 1326507024   ;;  %s696_s26 = smov [#allocation2]  }
  0x16   : > { %s165_s30 = scalar_lea.vmem %s837_s0, %s546_s27  ;;  %v692_v27 = vmov 683565275   ;;  %v693_v29 = vmov 2475754826   ;;  %v694_v32 = vmov 2131351028   ;;  %p627_p12 = pnand %p626_p11, %p755_p5 }
  0x17   : > { %v166_v2 = vld [vmem:[%s165_s30] sm:$0xff]  ;;  %s629_s16 = sshll.u32 %s696_s26, 4  ;;  %s630_s16 = int_to_ptr.vmem [resolvable:$false] %s629_s16 }
  0x18   : > { %v167_v3 = vmul.f32 100.0, %v166_v2  ;;  %p628_p13 = pneg %p627_p12  ;;  %s631_s27 = scalar_lea.vmem %s630_s16, 256 }
  0x19   : > { %p632_p0 = scmp.lt.s32.totalorder %s483_s11, %s630_s16  ;;  %p633_p1 = scmp.lt.s32.totalorder %s631_s27, %s625_s25 }
  0x1a   : > { %567 = vmatmul.mubr.msk.f32.vlgmr.msra.gmra.mxu0 %vm176_vm2, %v167_v3 }
  0x1b   : > { %p634_p2 = por %p633_p1, %p632_p0 }
  0x1d   : > { %p635_p3 = pnand %p634_p2, %p628_p13 }
  0xda   : > { %v250_v5 = vpop.f32.mrf.mxu0 }
  0xdb   : > { %v776_v6 = vadd.f32 %v547_v4, %v250_v5 }
  0xdc   : > { %v568_v7 = vpop.f32.mrf.mxu0 }
  0xdd   : > { %v257_v8 = vand.u32 2139095040, %v776_v6  ;;  %v254_v9 = vand.u32 2147483647, %v776_v6  ;;  %vm256_vm10 = vcmp.lt.s32.totalorder %v776_v6, 0  ;;  %vm346_vm2 = vweird.f32 %v776_v6 }
  0xdf   : > { %v258_v10 = vshrl.u32 %v257_v8, 23  ;;  %v261_v12 = vand.u32 8388607, %v254_v9  ;;  %vm255_vm11 = vcmp.le.f32.partialorder %v254_v9, 0.7853982 }
  0xe1   : > { %v550_v11 = vadd.s32 4294967169, %v258_v10  ;;  %v262_v15 = vor.u32 8388608, %v261_v12 }
  0xe3   : > { %v264_v13 = vadd.s32 1, %v550_v11  ;;  %v302_v23 = vshll.u32 %v262_v15, 8 }
  0xe5   : > { %vm265_vm3 = vcmp.gt.s32.totalorder %v264_v13, 0 }
  0xe6   : > { %v266_v14 = vsel %vm265_vm3, %v264_v13, 0  ;;  %vm465_vm3 = vcmask 523264  }
  0xe7   : > { %v268_v16 = vand.u32 31, %v266_v14  ;;  %v267_v17 = vshrl.u32 %v266_v14, 5 }
  0xe9   : > { %v269_v18 = vsub.s32 32, %v268_v16  ;;  %v280_v20 = vshll.u32 %v689_v19, %v268_v16  ;;  %v283_v22 = vshll.u32 %v690_v21, %v268_v16  ;;  %v271_v28 = vshll.u32 %v692_v27, %v268_v16 }
  0xea   : > { %v274_v31 = vshll.u32 %v693_v29, %v268_v16  ;;  %v277_v34 = vshll.u32 %v694_v32, %v268_v16  ;;  %vm289_vm4 = vcmp.lt.s32.totalorder %v267_v17, 4  ;;  %vm286_vm5 = vcmp.lt.s32.totalorder %v267_v17, 1 }
  0xeb   : > { %v281_v24 = vshrl.u32 %v690_v21, %v269_v18  ;;  %v284_v26 = vshrl.u32 %v691_v25, %v269_v18  ;;  %v272_v30 = vshrl.u32 %v693_v29, %v269_v18  ;;  %v275_v33 = vshrl.u32 %v694_v32, %v269_v18 }
  0xec   : > { %v278_v35 = vshrl.u32 %v689_v19, %v269_v18  ;;  %v270_v39 = vshrl.u32 %v692_v27, %v269_v18  ;;  %vm287_vm6 = vcmp.lt.s32.totalorder %v267_v17, 2  ;;  %vm288_vm7 = vcmp.lt.s32.totalorder %v267_v17, 3 }
  0xed   : > { %v282_v36 = vor.u32 %v281_v24, %v280_v20  ;;  %v285_v37 = vor.u32 %v284_v26, %v283_v22  ;;  %v273_v38 = vor.u32 %v272_v30, %v271_v28  ;;  %v276_v40 = vor.u32 %v275_v33, %v274_v31 }
  0xee   : > { %v279_v41 = vor.u32 %v278_v35, %v277_v34 }
  0xef   : > { %v295_v42 = vsel %vm289_vm4, %v282_v36, 920167782  ;;  %v299_v43 = vsel %vm289_vm4, %v285_v37, 1326507024  ;;  %v294_v45 = vsel %vm286_vm5, %v273_v38, %v276_v40  ;;  %v290_v48 = vsel %vm286_vm5, %v270_v39, %v273_v38 }
  0xf0   : > { %v291_v44 = vsel %vm289_vm4, %v279_v41, 2102212464  ;;  %v296_v46 = vsel %vm288_vm7, %v279_v41, %v295_v42  ;;  %v298_v47 = vsel %vm286_vm5, %v276_v40, %v279_v41  ;;  %v300_v51 = vsel %vm288_vm7, %v282_v36, %v299_v43 }
  0xf1   : > { %v292_v49 = vsel %vm288_vm7, %v276_v40, %v291_v44  ;;  %v297_v50 = vsel %vm287_vm6, %v294_v45, %v296_v46  ;;  %v301_v52 = vsel %vm287_vm6, %v298_v47, %v300_v51 }
  0xf2   : > { %v782_v53 = vmul.u32.u64.low %v302_v23, %v297_v50  ;;  %v783_v54 = vmul.u32.u64.high %v302_v23, %v297_v50, %v782_v53  ;;  %v785_v55 = vmul.u32.u64.low %v302_v23, %v301_v52  ;;  %v786_v56 = vmul.u32.u64.high %v302_v23, %v301_v52, %v785_v55 }
  0xf3   : > { %v293_v57 = vsel %vm287_vm6, %v290_v48, %v292_v49 }
  0xf4   : > { %v312_v58 = vadd.s32 1, %v783_v54  ;;  %v309_v59 = vmul.u32 %v302_v23, %v293_v57  ;;  %vm311_vm8 = vc.u32 %v786_v56, %v782_v53  ;;  %v310_v8 = vadd.s32 %v782_v53, %v786_v56 }
  0xf6   : > { %v313_v60 = vsel %vm311_vm8, %v312_v58, %v783_v54 }
  0xf7   : > { %v314_v61 = vadd.s32 %v313_v60, %v309_v59 }
  0xf9   : > { %v315_v62 = vadd.s32 536870912, %v314_v61 }
  0xfb   : > { %v316_v63 = vshrl.u32 %v315_v62, 30 }
  0xfd   : > { %v317_v0 = vshll.u32 %v316_v63, 30  ;;  %v340_v22 = vsub.s32 4, %v316_v63 }
  0xff   : > { %v318_v1 = vsub.s32 %v314_v61, %v317_v0  ;;  %v341_v25 = vsel %vm256_vm10, %v340_v22, %v316_v63 }
 0x100   : > { %v343_v26 = vsel %vm255_vm11, 0, %v341_v25 }
 0x101   : > { %v320_v2 = vsub.s32 0, %v318_v1  ;;  %v450_v27 = vadd.s32 3, %v343_v26  ;;  %v347_v28 = vand.u32 3, %v343_v26 }
 0x103   : > { %v551_v3 = vmin.u32 %v320_v2, %v318_v1  ;;  %v451_v29 = vand.u32 3, %v450_v27  ;;  %vm352_vm12 = vcmp.eq.s32.totalorder %v347_v28, 2  ;;  %vm349_vm14 = vcmp.eq.s32.totalorder %v347_v28, 0 }
 0x104   : > { %vm348_vm0 = vcmp.lt.s32.totalorder %v347_v28, 2 }
 0x105   : > { %v322_v4 = vclz %v551_v3  ;;  %vm456_vm13 = vcmp.eq.s32.totalorder %v451_v29, 2  ;;  %vm453_vm15 = vcmp.eq.s32.totalorder %v451_v29, 0  ;;  %vm452_vm1 = vcmp.lt.s32.totalorder %v451_v29, 2 }
 0x107   : > { %v552_v5 = vadd.s32 4294967294, %v322_v4 }
 0x109   : > { %vm553_vm9 = vcmp.lt.s32.totalorder %v552_v5, 0 }
 0x10a   : > { %v325_v7 = vsel %vm553_vm9, 0, %v552_v5 }
 0x10b   : > { %v326_v10 = vsub.s32 32, %v325_v7  ;;  %v330_v11 = vsub.s32 4294967266, %v325_v7  ;;  %v327_v12 = vshll.u32 %v318_v1, %v325_v7 }
 0x10d   : > { %v328_v13 = vshrl.u32 %v310_v8, %v326_v10  ;;  %v331_v14 = vadd.s32 127, %v330_v11 }
 0x10f   : > { %v329_v15 = vor.u32 %v328_v13, %v327_v12  ;;  %v332_v16 = vshll.u32 %v331_v14, 23 }
 0x111   : > { %v333_v17 = vor.u32 4788187, %v332_v16  ;;  %v336_v19 = vcvt.s32.f32 %v329_v15 }
 0x113   : > { %v334_v18 = vand.u32 2147483647, %v333_v17 }
 0x115   : > { %v337_v20 = vmul.f32 %v336_v19, %v334_v18 }
 0x117   : > { %v338_v21 = vxor.u32 2147483648, %v337_v20 }
 0x119   : > { %v339_v23 = vsel %vm256_vm10, %v338_v21, %v337_v20 }
 0x11a   : > { %v342_v24 = vsel %vm255_vm11, %v776_v6, %v339_v23 }
 0x11b   : > { %621 = vcosq.f32 %v342_v24 }
 0x11c   : > { %623 = vsinq.f32 %v342_v24 }
 0x128   : > { %v622_v30 = vpop.eup %621 }
 0x129   : > { %v624_v31 = vpop.eup %623  ;;  %v353_v32 = vxor.u32 2147483648, %v622_v30 }
 0x12a   : > { %v350_v33 = vxor.u32 2147483648, %v624_v31 }
 0x12b   : > { %v354_v34 = vsel %vm352_vm12, %v353_v32, %v624_v31  ;;  %v458_v9 = vsel %vm456_vm13, %v353_v32, %v624_v31 }
 0x12c   : > { %v351_v35 = vsel %vm349_vm14, %v622_v30, %v350_v33  ;;  %v455_v36 = vsel %vm453_vm15, %v622_v30, %v350_v33 }
 0x12d   : > { %v355_v37 = vsel %vm348_vm0, %v351_v35, %v354_v34  ;;  %v459_v38 = vsel %vm452_vm1, %v455_v36, %v458_v9 }
 0x12e   : > { %v356_v39 = vsel %vm346_vm2, nan, %v355_v37  ;;  %v460_v40 = vsel %vm346_vm2, nan, %v459_v38 }
 0x12f   : > { %462 = vrot.lane.b32.xlu0 %v460_v40, %s695_s6 }
 0x1a1   : > { %v463_v41 = vpop.permute.xlu0 %462 }
 0x1a2   : > { %v466_v6 = vsel %vm465_vm3, %v356_v39, %v463_v41 }
 0x1a3   : > { %467 = vst [vmem:[%s161_s10] sm:$0xff] %v466_v6 }
 0x1a4   : > { %638 = shalt.err (!%p635_p3)
}
 0x1a5   : > { %s639_s28 = scalar_lea.hbm %s802_s20, 128  ;;  %s643_s4 = scalar_lea.hbm %s840_s3, 256 }
 0x1a6   : > { %p640_p4 = scmp.ne.s32.totalorder %s802_s20, %s639_s28  ;;  %p644_p9 = scmp.lt.s32.totalorder %s802_s20, %s840_s3 }
 0x1a7   : > { %p645_p10 = scmp.lt.s32.totalorder %s643_s4, %s639_s28 }
 0x1a8   : > { %p641_p7 = pnand %p640_p4, %p755_p5 }
 0x1a9   : > { %p646_p11 = por %p645_p10, %p644_p9 }
 0x1aa   : > { %p642_p8 = pneg %p641_p7 }
 0x1ac   : > { %p647_p12 = pnand %p646_p11, %p642_p8 }
 0x1ae   : > { %650 = shalt.err (!%p647_p12)
}
 0x1af   : > { %573 = dma.vmem_to_hbm [thread:$0]  (%p755_p5), %s483_s11, 128, %s802_s20, %s469_s24  }
 0x1b0 PF: > { %p579_p13 = scmp.ge.s32.totalorder %s685_s15, 2  ;;  %s494_s7 = sand.u32 1, %s673_s12  }
 0x1b1   : > { %s495_s8 = scalar_lea.sflag [#allocation3], %s494_s7 }
 0x1b2   : > { %p576_p0 = pnand %p579_p13, %p759_p6 }
 0x1b4   : > { %p577_p1 = pneg %p576_p0 }
 0x1b6   : > { %668 = dma.done.wait (%p577_p1), %s495_s8, 128  }
 0x1b7   : > { %670 = vsyncadd (%p577_p1), %s495_s8, 4294967168  ;;  %p13_p2 = scmp.ge.s32.totalorder %s742_s18, 4   ;;  %s843_s12 = smov %s677_s13 }
 0x1b8   : > { %s844_s13 = smov %s681_s14  ;;  %s845_s14 = smov %s753_s21 }
 0x1b9   : > { %s846_s15 = smov %s742_s18  ;;  %15 = sbr.rel (!%p13_p2) target bundleno = 3 (0x3), region = 67 }
 0x1be   :  { %500 = vsyncpa [#allocation3], 1 }
 0x1bf   :  { %502 = vsyncpa [#allocation3 + $0x1], 1 }

</bundles_post_ra>
